<compile_context>
chip_gen: v6e
topology: v6e:2x2x1
jax: 0.10.0
libtpu: 0.0.40
codegen_flags: <defaults>
</compile_context>

<pallas_src>
import functools

import jax
import jax.numpy as jnp
from jax.experimental import pallas as pl
from jax.experimental.pallas import tpu as pltpu


def gat_conv_kernel(x_ref, w_ref, asrc_ref, adst_ref, bias_ref, adj_ref, o_ref,
                    *, negative_slope, apply_relu):
    x = x_ref[0]          # [N, F]  node features of this graph
    w = w_ref[0]          # [F, C]  this head's weight
    a_src = asrc_ref[0]   # [1, C]
    a_dst = adst_ref[0]   # [1, C]
    bias = bias_ref[0]    # [1, C]
    adj = adj_ref[0]      # [N, N]  adj[i, j] = 1.0 iff edge j -> i (self loops incl.)

    # Per-head linear transform on the MXU (f32 accumulation).
    h = jnp.dot(x, w, preferred_element_type=jnp.float32)              # [N, C]

    # Attention logits: target term on sublanes, source term as a lane-dense row
    # (avoids an N=1-output matmul and an explicit in-kernel transpose).
    e_dst = jnp.sum(h * a_dst, axis=-1, keepdims=True)                 # [N, 1]  VPU
    e_src = jax.lax.dot_general(a_src, h,
                                dimension_numbers=(((1,), (1,)), ((), ())),
                                preferred_element_type=jnp.float32)    # [1, N]  MXU
    scores = e_dst + e_src                                             # [N, N]
    scores = jnp.where(scores > 0, scores, negative_slope * scores)    # LeakyReLU
    scores = jnp.where(adj > 0, scores, jnp.float32(-1e30))            # mask non-edges

    # Softmax over source nodes (lane axis); self-loops guarantee a valid row.
    m = jnp.max(scores, axis=-1, keepdims=True)
    p = jnp.exp(scores - m)
    alpha = p / jnp.sum(p, axis=-1, keepdims=True)                     # [N, N]

    # Aggregate neighbour features, add bias, optional fused ReLU.
    out = jnp.dot(alpha, h, preferred_element_type=jnp.float32) + bias  # [N, C]
    if apply_relu:
        out = jnp.maximum(out, 0.0)
    o_ref[0, 0] = out.astype(o_ref.dtype)


def gat_conv(x, adj, w, a_src, a_dst, bias, *, apply_relu, negative_slope=0.2):
    """One dense GATConv layer for a batch of equally-sized graphs.

    x:     [B, N, F]   adj: [B, N, N]   w: [H, F, C]
    a_src, a_dst: [H, C]                bias: [H * C]
    returns [B, N, H*C] (head concat).
    """
    B, N, F = x.shape
    H, Fw, C = w.shape
    assert Fw == F

    flops = 2 * B * H * (N * F * C + N * N * C + N * N)
    bytes_accessed = 4 * (B * N * F + H * F * C + 3 * H * C
                          + B * N * N + B * H * N * C)

    out = pl.pallas_call(
        functools.partial(gat_conv_kernel,
                          negative_slope=negative_slope,
                          apply_relu=apply_relu),
        out_shape=jax.ShapeDtypeStruct((B, H, N, C), jnp.float32),
        grid=(B, H),
        in_specs=[
            pl.BlockSpec((1, N, F), lambda b, h: (b, 0, 0)),   # x   (per graph)
            pl.BlockSpec((1, F, C), lambda b, h: (h, 0, 0)),   # W   (per head)
            pl.BlockSpec((1, 1, C), lambda b, h: (h, 0, 0)),   # a_src
            pl.BlockSpec((1, 1, C), lambda b, h: (h, 0, 0)),   # a_dst
            pl.BlockSpec((1, 1, C), lambda b, h: (h, 0, 0)),   # bias
            pl.BlockSpec((1, N, N), lambda b, h: (b, 0, 0)),   # adjacency mask
        ],
        out_specs=pl.BlockSpec((1, 1, N, C), lambda b, h: (b, h, 0, 0)),
        compiler_params=pltpu.CompilerParams(
            dimension_semantics=("parallel", "parallel")),
        cost_estimate=pl.CostEstimate(flops=flops,
                                      transcendentals=B * H * N * N,
                                      bytes_accessed=bytes_accessed),
    )(x.astype(jnp.float32), w.astype(jnp.float32),
      a_src.reshape(H, 1, C).astype(jnp.float32),
      a_dst.reshape(H, 1, C).astype(jnp.float32),
      bias.reshape(H, 1, C).astype(jnp.float32),
      adj.astype(jnp.float32))

    # [B, H, N, C] -> [B, N, H*C]  (head concat done in the wrapper)
    return jnp.transpose(out, (0, 2, 1, 3)).reshape(B, N, H * C)


def edges_to_adj(edge_indexs, num_nodes):
    # edge_indexs: [B, 2, E] int32; row 0 = source, row 1 = target (PyG convention).
    src = edge_indexs[:, 0, :]
    dst = edge_indexs[:, 1, :]
    B, E = src.shape
    adj = jnp.zeros((B, num_nodes, num_nodes), jnp.float32)
    b_idx = jnp.broadcast_to(jnp.arange(B)[:, None], (B, E))
    adj = adj.at[b_idx, dst, src].set(1.0)                 # adj[i, j]=1 iff edge j -> i
    eye = jnp.eye(num_nodes, dtype=jnp.float32)[None]
    return jnp.maximum(adj, eye)                           # add_self_loops=True


def gat_forward(xs, edge_indexs, params, num_nodes):
    adj = edges_to_adj(edge_indexs, num_nodes)
    h = gat_conv(xs, adj, params["w1"], params["a_src1"], params["a_dst1"],
                 params["b1"], apply_relu=True)
    # TODO(synk): F.dropout(p=0.5) in the torch forward is stochastic (and applied even
    # in eval mode); omitted here so the kernel forward is deterministic.
    return gat_conv(h, adj, params["w2"], params["a_src2"], params["a_dst2"],
                    params["b2"], apply_relu=False)


# ---------------- pure-JAX reference (dense GATConv, same math) ----------------

def gat_conv_ref(x, adj, w, a_src, a_dst, bias, *, apply_relu, negative_slope=0.2):
    hp = jax.lax.Precision.HIGHEST
    h = jnp.einsum("bnf,hfc->bhnc", x, w, precision=hp)
    e_src = jnp.einsum("bhnc,hc->bhn", h, a_src, precision=hp)
    e_dst = jnp.einsum("bhnc,hc->bhn", h, a_dst, precision=hp)
    scores = e_dst[:, :, :, None] + e_src[:, :, None, :]
    scores = jnp.where(scores > 0, scores, negative_slope * scores)
    scores = jnp.where(adj[:, None] > 0, scores, -1e30)
    alpha = jax.nn.softmax(scores, axis=-1)
    out = jnp.einsum("bhij,bhjc->bhic", alpha, h, precision=hp)
    B, H, N, C = out.shape
    out = jnp.transpose(out, (0, 2, 1, 3)).reshape(B, N, H * C) + bias
    return jnp.maximum(out, 0.0) if apply_relu else out


def gat_forward_ref(xs, edge_indexs, params, num_nodes):
    adj = edges_to_adj(edge_indexs, num_nodes)
    h = gat_conv_ref(xs, adj, params["w1"], params["a_src1"], params["a_dst1"],
                     params["b1"], apply_relu=True)
    return gat_conv_ref(h, adj, params["w2"], params["a_src2"], params["a_dst2"],
                        params["b2"], apply_relu=False)


if __name__ == "__main__":
    key = jax.random.PRNGKey(0)
    ks = jax.random.split(key, 10)

    B, N, F, C, H = 2, 16, 32, 8, 8       # graphs, nodes, num_features, hidden, heads
    E = 40                                # edges per graph

    xs = jax.random.normal(ks[0], (B, N, F), dtype=jnp.float32)
    edge_indexs = jax.random.randint(ks[1], (B, 2, E), 0, N, dtype=jnp.int32)

    def init(k, shape, fan_in):
        bound = 1.0 / jnp.sqrt(jnp.float32(fan_in))
        return jax.random.uniform(k, shape, minval=-bound, maxval=bound,
                                  dtype=jnp.float32)

    params = {
        # conv1: GATConv(F -> C, heads=H), head concat -> [N, H*C]
        "w1": init(ks[2], (H, F, C), F),
        "a_src1": init(ks[3], (H, C), C),
        "a_dst1": init(ks[4], (H, C), C),
        "b1": init(ks[5], (H * C,), C),
        # conv2: GATConv(H*C -> C, heads=1) -> [N, C]
        "w2": init(ks[6], (1, H * C, C), H * C),
        "a_src2": init(ks[7], (1, C), C),
        "a_dst2": init(ks[8], (1, C), C),
        "b2": init(ks[9], (C,), C),
    }

    out = gat_forward(xs, edge_indexs, params, num_nodes=N)
    out = jax.block_until_ready(out)

    ref = gat_forward_ref(xs, edge_indexs, params, num_nodes=N)
    assert out.shape == (B, N, C), out.shape
    assert jnp.allclose(out, ref, atol=2e-3, rtol=2e-3), "mismatch vs reference"

    print("KERNEL_OK")
</pallas_src>

<mosaic_0001>
module attributes {stable_mosaic.version = 11 : i64} {
  func.func @gat_conv_kernel(%arg0: i32, %arg1: i32, %arg2: memref<1x16x32xf32, #tpu.memory_space<vmem>>, %arg3: memref<1x32x8xf32, #tpu.memory_space<vmem>>, %arg4: memref<1x1x8xf32, #tpu.memory_space<vmem>>, %arg5: memref<1x1x8xf32, #tpu.memory_space<vmem>>, %arg6: memref<1x1x8xf32, #tpu.memory_space<vmem>>, %arg7: memref<1x16x16xf32, #tpu.memory_space<vmem>>, %arg8: memref<1x1x16x8xf32, #tpu.memory_space<vmem>>) attributes {dimension_semantics = [#tpu.dimension_semantics<parallel>, #tpu.dimension_semantics<parallel>], iteration_bounds = array<i64: 2, 8>, scalar_prefetch = 0 : i64, scratch_operands = 0 : i64, tpu.core_type = #tpu.core_type<tc>, window_params = [{transform_indices = @transform_0, window_bounds = array<i64: 1, 16, 32>}, {transform_indices = @transform_1, window_bounds = array<i64: 1, 32, 8>}, {transform_indices = @transform_2, window_bounds = array<i64: 1, 1, 8>}, {transform_indices = @transform_3, window_bounds = array<i64: 1, 1, 8>}, {transform_indices = @transform_4, window_bounds = array<i64: 1, 1, 8>}, {transform_indices = @transform_5, window_bounds = array<i64: 1, 16, 16>}, {transform_indices = @transform_6, window_bounds = array<i64: 1, 1, 16, 8>}]} {
    %c0 = arith.constant 0 : index
    %c0_0 = arith.constant 0 : index
    %c0_1 = arith.constant 0 : index
    %0 = vector.load %arg2[%c0, %c0_0, %c0_1] : memref<1x16x32xf32, #tpu.memory_space<vmem>>, vector<1x16x32xf32>
    %1 = vector.shape_cast %0 : vector<1x16x32xf32> to vector<16x32xf32>
    %c0_2 = arith.constant 0 : index
    %c0_3 = arith.constant 0 : index
    %c0_4 = arith.constant 0 : index
    %2 = vector.load %arg3[%c0_2, %c0_3, %c0_4] : memref<1x32x8xf32, #tpu.memory_space<vmem>>, vector<1x32x8xf32>
    %3 = vector.shape_cast %2 : vector<1x32x8xf32> to vector<32x8xf32>
    %c0_5 = arith.constant 0 : index
    %c0_6 = arith.constant 0 : index
    %c0_7 = arith.constant 0 : index
    %4 = vector.load %arg4[%c0_5, %c0_6, %c0_7] : memref<1x1x8xf32, #tpu.memory_space<vmem>>, vector<1x1x8xf32>
    %5 = vector.shape_cast %4 : vector<1x1x8xf32> to vector<1x8xf32>
    %c0_8 = arith.constant 0 : index
    %c0_9 = arith.constant 0 : index
    %c0_10 = arith.constant 0 : index
    %6 = vector.load %arg5[%c0_8, %c0_9, %c0_10] : memref<1x1x8xf32, #tpu.memory_space<vmem>>, vector<1x1x8xf32>
    %7 = vector.shape_cast %6 : vector<1x1x8xf32> to vector<1x8xf32>
    %c0_11 = arith.constant 0 : index
    %c0_12 = arith.constant 0 : index
    %c0_13 = arith.constant 0 : index
    %8 = vector.load %arg6[%c0_11, %c0_12, %c0_13] : memref<1x1x8xf32, #tpu.memory_space<vmem>>, vector<1x1x8xf32>
    %9 = vector.shape_cast %8 : vector<1x1x8xf32> to vector<1x8xf32>
    %c0_14 = arith.constant 0 : index
    %c0_15 = arith.constant 0 : index
    %c0_16 = arith.constant 0 : index
    %10 = vector.load %arg7[%c0_14, %c0_15, %c0_16] : memref<1x16x16xf32, #tpu.memory_space<vmem>>, vector<1x16x16xf32>
    %11 = vector.shape_cast %10 : vector<1x16x16xf32> to vector<16x16xf32>
    %cst = arith.constant dense<0.000000e+00> : vector<16x8xf32>
    %12 = tpu.matmul %1, %3, %cst {dimension_numbers = #tpu.dot_dimension_numbers<[1], [0], [0], [1], [0, 0, 1, 1], [], []>} : vector<16x32xf32>, vector<32x8xf32>, vector<16x8xf32> -> vector<16x8xf32>
    %13 = vector.broadcast %7 : vector<1x8xf32> to vector<16x8xf32>
    %14 = arith.mulf %12, %13 : vector<16x8xf32>
    %cst_17 = arith.constant dense<0.000000e+00> : vector<16xf32>
    %15 = vector.multi_reduction <add>, %14, %cst_17 [1] : vector<16x8xf32> to vector<16xf32>
    %16 = vector.shape_cast %15 : vector<16xf32> to vector<16x1xf32>
    %cst_18 = arith.constant dense<0.000000e+00> : vector<1x16xf32>
    %17 = tpu.matmul %5, %12, %cst_18 {dimension_numbers = #tpu.dot_dimension_numbers<[1], [1], [0], [0], [0, 0, 1, 0], [], []>} : vector<1x8xf32>, vector<16x8xf32>, vector<1x16xf32> -> vector<1x16xf32>
    %18 = vector.broadcast %16 : vector<16x1xf32> to vector<16x16xf32>
    %19 = vector.broadcast %17 : vector<1x16xf32> to vector<16x16xf32>
    %20 = arith.addf %18, %19 : vector<16x16xf32>
    %cst_19 = arith.constant 0.000000e+00 : f32
    %21 = vector.broadcast %cst_19 : f32 to vector<16x16xf32>
    %22 = arith.cmpf ogt, %20, %21 : vector<16x16xf32>
    %cst_20 = arith.constant 2.000000e-01 : f32
    %23 = vector.broadcast %cst_20 : f32 to vector<16x16xf32>
    %24 = arith.mulf %23, %20 : vector<16x16xf32>
    %25 = arith.select %22, %20, %24 : vector<16x16xi1>, vector<16x16xf32>
    %cst_21 = arith.constant 0.000000e+00 : f32
    %26 = vector.broadcast %cst_21 : f32 to vector<16x16xf32>
    %27 = arith.cmpf ogt, %11, %26 : vector<16x16xf32>
    %cst_22 = arith.constant -1.000000e+30 : f32
    %28 = vector.broadcast %cst_22 : f32 to vector<16x16xf32>
    %29 = arith.select %27, %25, %28 : vector<16x16xi1>, vector<16x16xf32>
    %cst_23 = arith.constant dense<0xFF800000> : vector<16xf32>
    %30 = vector.multi_reduction <maximumf>, %29, %cst_23 [1] : vector<16x16xf32> to vector<16xf32>
    %31 = vector.shape_cast %30 : vector<16xf32> to vector<16x1xf32>
    %32 = vector.broadcast %31 : vector<16x1xf32> to vector<16x16xf32>
    %33 = arith.subf %29, %32 : vector<16x16xf32>
    %34 = math.exp %33 : vector<16x16xf32>
    %cst_24 = arith.constant dense<0.000000e+00> : vector<16xf32>
    %35 = vector.multi_reduction <add>, %34, %cst_24 [1] : vector<16x16xf32> to vector<16xf32>
    %36 = vector.shape_cast %35 : vector<16xf32> to vector<16x1xf32>
    %37 = vector.broadcast %36 : vector<16x1xf32> to vector<16x16xf32>
    %38 = arith.divf %34, %37 : vector<16x16xf32>
    %cst_25 = arith.constant dense<0.000000e+00> : vector<16x8xf32>
    %39 = tpu.matmul %38, %12, %cst_25 {dimension_numbers = #tpu.dot_dimension_numbers<[1], [0], [0], [1], [0, 0, 1, 1], [], []>} : vector<16x16xf32>, vector<16x8xf32>, vector<16x8xf32> -> vector<16x8xf32>
    %40 = vector.broadcast %9 : vector<1x8xf32> to vector<16x8xf32>
    %41 = arith.addf %39, %40 : vector<16x8xf32>
    %cst_26 = arith.constant 0.000000e+00 : f32
    %42 = vector.broadcast %cst_26 : f32 to vector<16x8xf32>
    %43 = arith.maximumf %41, %42 : vector<16x8xf32>
    %c0_27 = arith.constant 0 : index
    %c0_28 = arith.constant 0 : index
    %c0_29 = arith.constant 0 : index
    %c0_30 = arith.constant 0 : index
    %44 = vector.load %arg8[%c0_27, %c0_28, %c0_29, %c0_30] : memref<1x1x16x8xf32, #tpu.memory_space<vmem>>, vector<1x1x16x8xf32>
    %45 = vector.shape_cast %44 : vector<1x1x16x8xf32> to vector<16x8xf32>
    %46 = vector.shape_cast %43 : vector<16x8xf32> to vector<1x1x16x8xf32>
    tpu.vector_store %arg8[%c0_27, %c0_28, %c0_29, %c0_30], %46 {strides = array<i32>} : memref<1x1x16x8xf32, #tpu.memory_space<vmem>>, vector<1x1x16x8xf32>,
    return
  }
  func.func @transform_0(%arg0: i32, %arg1: i32) -> (i32, i32, i32) {
    %c0_i32 = arith.constant 0 : i32
    %c0_i32_0 = arith.constant 0 : i32
    %c0_i32_1 = arith.constant 0 : i32
    return %arg0, %c0_i32, %c0_i32_0 : i32, i32, i32
  }
  func.func @transform_1(%arg0: i32, %arg1: i32) -> (i32, i32, i32) {
    %c0_i32 = arith.constant 0 : i32
    %c0_i32_0 = arith.constant 0 : i32
    %c0_i32_1 = arith.constant 0 : i32
    return %arg1, %c0_i32, %c0_i32_0 : i32, i32, i32
  }
  func.func @transform_2(%arg0: i32, %arg1: i32) -> (i32, i32, i32) {
    %c0_i32 = arith.constant 0 : i32
    %c0_i32_0 = arith.constant 0 : i32
    %c0_i32_1 = arith.constant 0 : i32
    return %arg1, %c0_i32, %c0_i32_0 : i32, i32, i32
  }
  func.func @transform_3(%arg0: i32, %arg1: i32) -> (i32, i32, i32) {
    %c0_i32 = arith.constant 0 : i32
    %c0_i32_0 = arith.constant 0 : i32
    %c0_i32_1 = arith.constant 0 : i32
    return %arg1, %c0_i32, %c0_i32_0 : i32, i32, i32
  }
  func.func @transform_4(%arg0: i32, %arg1: i32) -> (i32, i32, i32) {
    %c0_i32 = arith.constant 0 : i32
    %c0_i32_0 = arith.constant 0 : i32
    %c0_i32_1 = arith.constant 0 : i32
    return %arg1, %c0_i32, %c0_i32_0 : i32, i32, i32
  }
  func.func @transform_5(%arg0: i32, %arg1: i32) -> (i32, i32, i32) {
    %c0_i32 = arith.constant 0 : i32
    %c0_i32_0 = arith.constant 0 : i32
    %c0_i32_1 = arith.constant 0 : i32
    return %arg0, %c0_i32, %c0_i32_0 : i32, i32, i32
  }
  func.func @transform_6(%arg0: i32, %arg1: i32) -> (i32, i32, i32, i32) {
    %c0_i32 = arith.constant 0 : i32
    %c0_i32_0 = arith.constant 0 : i32
    %c0_i32_1 = arith.constant 0 : i32
    return %arg0, %arg1, %c0_i32, %c0_i32_0 : i32, i32, i32, i32
  }
}

</mosaic_0001>

<bundles_post_ra>
// kernel: tpu_custom_call.1
= control target key start
LH: loop header
LB: loop body
LE: loop exit
PB: predicated region body
PF: predicated region fallthrough
CT: control target
= control target key end

     0   :  { %s1003_s21 = smov 0   ;;  %s1005_s22 = smov 0   ;;  %s1096_s0 = inlined_call_operand.vmem [shape: f32[2,16,32], index: 0, kind: input, shape index: {}]   ;;  %s1097_s1 = inlined_call_operand.vmem [shape: f32[8,32,8], index: 1, kind: input, shape index: {}]   ;;  %s1098_s2 = inlined_call_operand.vmem [shape: f32[8,1,8], index: 2, kind: input, shape index: {}]   ;;  %s1099_s3 = inlined_call_operand.vmem [shape: f32[8,1,8], index: 3, kind: input, shape index: {}]   ;;  %s1100_s4 = inlined_call_operand.vmem [shape: f32[8,1,8], index: 4, kind: input, shape index: {}]   ;;  %s1101_s5 = inlined_call_operand.vmem [shape: f32[2,16,16], index: 5, kind: input, shape index: {}]   ;;  %s1102_s6 = inlined_call_operand.vmem [shape: f32[2,8,16,8], index: 6, kind: output, shape index: {}]  }
   0x1   :  { %s1007_s23 = smov 0   ;;  %s1009_s24 = smov 0  }
   0x2   :  { %s1011_s25 = smov 0  }
   0x3 LB: > { %s25_s26 = sadd.s32 1, %s956_s23  ;;  %s28_s27 = sadd.s32 1, %s960_s24  ;;  %s964_s25 = sphi %s1011_s25, %s16_s25   ;;  %s960_s24 = sphi %s1009_s24, %s1106_s24   ;;  %s956_s23 = sphi %s1007_s23, %s1105_s23   ;;  %s952_s22 = sphi %s1005_s22, %s1104_s22   ;;  %s948_s21 = sphi %s1003_s21, %s1103_s21  }
   0x4   : > { %p26_p0 = scmp.ge.s32.totalorder %s25_s26, 8  ;;  %p814_p1 = scmp.ge.s32.totalorder %s964_s25, 1 }
   0x5   : > { %p270_p2 = scmp.lt.s32.totalorder %s964_s25, 17 }
   0x6   : > { %s1108_s26 = smov (%p26_p0, %s25_s26), 0  ;;  %s1110_s27 = smov (!%p26_p0, %s28_s27), %s960_s24 }
   0x7   : > { %p271_p3 = pnand %p814_p1, %p270_p2  ;;  %p30_p4 = scmp.ge.s32.totalorder %s1110_s27, 2 }
   0x8   : > { %p328_p5 = scmp.lt.s32.totalorder (!%p271_p3), %s948_s21, 7  ;;  %p323_p6 = scmp.lt.s32.totalorder (!%p271_p3), %s952_s22, 1 }
   0x9   : > { %s1112_s27 = smov (%p30_p4, %s1110_s27), 0  ;;  %274 = sbr.rel (%p271_p3) target bundleno = 943 (0x3af), region = 44 }
   0xe   : > { %s1114_s21 = smov (!%p328_p5, %s948_s21), 7  ;;  %s1116_s22 = smov (!%p323_p6, %s952_s22), 1  ;;  %vm367_vm0 = vcmask 261120   ;;  %v966_v6 = vmov 0.0   ;;  %vm967_vm1 = vmmov 0   ;;  %vm457_vm2 = vcmask 64512  }
   0xf   : > { %s836_s28 = sshll.u32 %s1114_s21, 5  ;;  %s1039_s8 = sshll.u32 %s1116_s22, 4  ;;  %862 = vmatprep.subr.mxu1 %v966_v6  ;;  %866 = vmatprep.mubr.msk.f32.mxu1 %vm967_vm1, %v966_v6  ;;  %v543_v15 = vlaneseq  ;;  %vm559_vm6 = vcmask 130048  }
  0x10   : > { %s332_s7 = scalar_lea.vmem %s1097_s1, %s836_s28  ;;  %s327_s11 = scalar_lea.vmem %s1096_s0, %s1039_s8 }
  0x11   : > { %v361_v0 = vld [vmem:[%s332_s7 + $0x18] sm:$0xff]  ;;  %v360_v1 = vld [vmem:[%s332_s7 + $0x10] sm:$0xff]  ;;  %v356_v2 = vld [vmem:[%s327_s11] sm:$0xff]  ;;  %s338_s14 = scalar_lea.vmem %s1099_s3, %s1114_s21  ;;  %s335_s17 = scalar_lea.vmem %s1098_s2, %s1114_s21  ;;  %v544_v16 = vshrl.u32 %v543_v15, 7 }
  0x12   : > { %851 = vmatprep.subr.mxu0 %v361_v0  ;;  %v359_v3 = vld [vmem:[%s332_s7 + $0x8] sm:$0xff]  ;;  %859 = vmatprep.mubr.msk.f32.mxu0 %vm367_vm0, %v356_v2  ;;  %v358_v4 = vld [vmem:[%s332_s7] sm:$0xff]  ;;  %s346_s20 = scalar_lea.vmem %s1101_s5, %s1039_s8  ;;  %s821_s22 = sshll.u32 %s1114_s21, 1 }
  0x13   : > { %852 = vmatpush3.msra.mxu0 %v361_v0  ;;  %v357_v5 = vld [vmem:[%s327_s11 + $0x8] sm:$0xff]  ;;  %v826_v9 = vld [vmem:[%s338_s14] ss:$0 sm:$0xff]  ;;  %v545_v18 = vsub.s32 0, %v544_v16  ;;  %s341_s30 = scalar_lea.vmem %s1100_s4, %s1114_s21  ;;  %s353_s7 = sadd.s32 %s1039_s8, %s821_s22 }
  0x14   : > { %853 = vmatprep.subr.mxu0 %v360_v1  ;;  %v362_v12 = vld [vmem:[%s335_s17] sm:$0x1]  ;;  %v366_v26 = vld [vmem:[%s346_s20 + $0x8] sm:$0xff]  ;;  %s823_s9 = sshll.u32 %s353_s7, 3 }
  0x15   : > { %854 = vmatpush3.msra.mxu0 %v360_v1  ;;  %v365_v21 = vld [vmem:[%s346_s20] sm:$0xff]  ;;  %vm556_vm7 = vcmp.gt.f32.partialorder %v366_v26, 0.0  ;;  %s355_s12 = scalar_lea.vmem %s1102_s6, %s823_s9 }
  0x16   : > { %855 = vmatprep.subr.mxu0 %v359_v3  ;;  %vm555_vm3 = vcmp.gt.f32.partialorder %v365_v21, 0.0  ;;  %v830_v51 = vld [vmem:[%s341_s30] ss:$0 sm:$0xff] }
  0x17   : > { %856 = vmatpush3.msra.mxu0 %v359_v3 }
  0x18   : > { %857 = vmatprep.subr.mxu0 %v358_v4 }
  0x19   : > { %858 = vmatpush3.msra.mxu0 %v358_v4 }
  0x1a   : > { %860 = vmatmul.mubr.msk.f32.vlgmr.msra.gmra.mxu0 %vm367_vm0, %v357_v5 }
  0xda   : > { %v861_v7 = vpop.f32.mrf.mxu0 }
  0xdb   : > { %863 = vmatpush3.xpose.msk.msra.mxu1 %vm457_vm2, %v861_v7  ;;  %869 = vmatprep.subr.mxu0 %v861_v7  ;;  %v456_v13 = vmul.f32 %v861_v7, %v826_v9 }
  0xdc   : > { %v440_v8 = vpop.f32.mrf.mxu0  ;;  %870 = vmatpush3.msra.mxu0 %v861_v7  ;;  %864 = vmatprep.subr.mxu1 %v966_v6 }
  0xdd   : > { %871 = vmatprep.subr.mxu0 %v440_v8  ;;  %v455_v10 = vmul.f32 %v826_v9, %v440_v8  ;;  %v461_v14 = vsel %vm457_vm2, %v456_v13, 0.0 }
  0xde   : > { %872 = vmatpush3.msra.mxu0 %v440_v8 }
  0xdf   : > { %865 = vmatpush3.xpose.msk.msra.mxu1 %vm457_vm2, %v440_v8  ;;  %v458_v11 = vsel %vm457_vm2, %v455_v10, 0.0 }
  0xe0   : > { %459 = vadd.xlane.f32.xlu0 %v458_v11 }
  0xe2   : > { %867 = vmatmul.mubr.msk.f32.vlgmr.msra.gmra.mxu1 %vm457_vm2, %v362_v12 }
  0xe4   : > { %462 = vadd.xlane.f32.xlu0 %v461_v14 }
 0x169   : > { %v460_v17 = vpop.xlane.xlu0 %459 }
 0x16d   : > { %v463_v22 = vpop.xlane.xlu0 %462 }
 0x1a2   : > { %v539_v19 = vpop.f32.mrf.mxu1 }
 0x1a3   : > { %v546_v20 = vrot.slane %v539_v19, %v545_v18 }
 0x1a4   : > { %v868_v23 = vpop.f32.mrf.mxu1 }
 0x1a5   : > { %v547_v24 = vadd.f32 %v546_v20, %v460_v17  ;;  %v548_v25 = vadd.f32 %v546_v20, %v463_v22 }
 0x1a7   : > { %vm549_vm4 = vcmp.gt.f32.partialorder %v547_v24, 0.0  ;;  %v551_v27 = vmul.f32 0.2, %v547_v24  ;;  %vm550_vm5 = vcmp.gt.f32.partialorder %v548_v25, 0.0  ;;  %v552_v28 = vmul.f32 0.2, %v548_v25 }
 0x1a9   : > { %v553_v29 = vsel %vm549_vm4, %v547_v24, %v551_v27  ;;  %v554_v30 = vsel %vm550_vm5, %v548_v25, %v552_v28 }
 0x1aa   : > { %v557_v31 = vsel %vm555_vm3, %v553_v29, -1e+30  ;;  %v558_v33 = vsel %vm556_vm7, %v554_v30, -1e+30 }
 0x1ab   : > { %v560_v32 = vsel %vm559_vm6, %v557_v31, -inf  ;;  %v563_v34 = vsel %vm559_vm6, %v558_v33, -inf }
 0x1ac   : > { %561 = vmax.xlane.f32.xlu1 %v560_v32 }
 0x1b0   : > { %564 = vmax.xlane.f32.xlu1 %v563_v34 }
 0x235   : > { %v562_v35 = vpop.xlane.xlu1 %561 }
 0x236   : > { %v566_v36 = vsub.f32 %v557_v31, %v562_v35 }
 0x238   : > { %v568_v37 = vmul.f32 1.442695, %v566_v36 }
 0x239   : > { %v565_v38 = vpop.xlane.xlu1 %564 }
 0x23a   : > { %918 = vpow2.f32 %v568_v37  ;;  %v567_v39 = vsub.f32 %v558_v33, %v565_v38 }
 0x23c   : > { %v570_v40 = vmul.f32 1.442695, %v567_v39 }
 0x23e   : > { %920 = vpow2.f32 %v570_v40 }
 0x247   : > { %v919_v41 = vpop.eup %918 }
 0x248   : > { %v572_v42 = vsel %vm559_vm6, %v919_v41, 0.0 }
 0x249   : > { %573 = vadd.xlane.f32.xlu0 %v572_v42 }
 0x24b   : > { %v921_v43 = vpop.eup %920 }
 0x24c   : > { %v575_v44 = vsel %vm559_vm6, %v921_v43, 0.0 }
 0x24d   : > { %576 = vadd.xlane.f32.xlu1 %v575_v44 }
 0x2d2   : > { %v574_v45 = vpop.xlane.xlu0 %573 }
 0x2d3   : > { %922 = vrcp.f32 %v574_v45 }
 0x2d6   : > { %v577_v46 = vpop.xlane.xlu1 %576 }
 0x2d7   : > { %924 = vrcp.f32 %v577_v46 }
 0x2e0   : > { %v923_v47 = vpop.eup %922 }
 0x2e1   : > { %v579_v48 = vmul.f32 %v923_v47, %v919_v41 }
 0x2e3   : > { %873 = vmatprep.mubr.msk.f32.mxu0 %vm559_vm6, %v579_v48 }
 0x2e4   : > { %v925_v49 = vpop.eup %924 }
 0x2e5   : > { %v581_v50 = vmul.f32 %v925_v49, %v921_v43 }
 0x2e7   : > { %874 = vmatmul.mubr.msk.f32.vlgmr.msra.gmra.mxu0 %vm559_vm6, %v581_v50 }
 0x3a7   : > { %v875_v52 = vpop.f32.mrf.mxu0 }
 0x3a8   : > { %v666_v53 = vadd.f32 %v875_v52, %v830_v51 }
 0x3a9   : > { %v660_v54 = vpop.f32.mrf.mxu0 }
 0x3aa   : > { %v670_v55 = vmax.f32 %v666_v53, 0.0  ;;  %v661_v56 = vadd.f32 %v830_v51, %v660_v54 }
 0x3ac   : > { %672 = vst.msk [vmem:[%s355_s12 + $0x8] sm:$0xff] %vm457_vm2, %v670_v55  ;;  %v669_v57 = vmax.f32 %v661_v56, 0.0 }
 0x3ae   : > { %671 = vst.msk [vmem:[%s355_s12] sm:$0xff] %vm457_vm2, %v669_v57 }
 0x3af PF: > { %s16_s25 = sadd.s32 1, %s964_s25   ;;  %s1103_s21 = smov %s956_s23 }
 0x3b0   : > { %p13_p7 = scmp.ge.s32.totalorder %s16_s25, 18   ;;  %s1104_s22 = smov %s960_s24 }
 0x3b1   : > { %s1105_s23 = smov %s1108_s26  ;;  %s1106_s24 = smov %s1112_s27 }
 0x3b2   :  { %15 = sbr.rel (!%p13_p7) target bundleno = 3 (0x3), region = 89 }

</bundles_post_ra>
